<compile_context>
chip_gen: v7x
topology: tpu7x:2x2x1
jax: 0.10.0
libtpu: 0.0.40
codegen_flags: <defaults>
</compile_context>

<pallas_src>
import functools

import jax
import jax.numpy as jnp
from jax.experimental import pallas as pl
from jax.experimental.pallas import tpu as pltpu

_LANES = 128
_SUBLANES = 8
# 4096 rows x 128 lanes x 4 B = 2 MiB per input per pipeline buffer.
# 2 inputs x 2 buffers x 2 MiB = 8 MiB, inside the default scoped VMEM on
# v5e (16 MiB) and v6e/v7x (32 MiB).
_MAX_BLOCK_ROWS = 4096


def _reduce_and_store(x, t, out_ref):
    # Per-lane partial sums: VPU multiplies + row-axis adds only, no cross-lane
    # XLU reduction in-kernel. Rows 0-2 of the (1, 8, 128) tile hold the
    # per-lane partials for sum(x*t), sum(x), sum(t).
    out_ref[0, 0:1, :] = jnp.sum(x * t, axis=0, keepdims=True)  # -> tp
    out_ref[0, 1:2, :] = jnp.sum(x, axis=0, keepdims=True)      # fp = sx - sxt
    out_ref[0, 2:3, :] = jnp.sum(t, axis=0, keepdims=True)      # fn = st - sxt


def _focal_tversky_partials_kernel(x_ref, t_ref, out_ref, *,
                                   block_rows, total_rows, need_mask):
    x = x_ref[...].astype(jnp.float32)
    t = t_ref[...].astype(jnp.float32)

    if need_mask:
        # Only the final grid step can be ragged; keep the mask work off the
        # VALU path of every other step.
        step = pl.program_id(0)
        is_last = step == pl.num_programs(0) - 1

        @pl.when(is_last)
        def _():
            # Out-of-bounds rows of the last block read unspecified values;
            # zero them before any arithmetic (this mask is load-bearing).
            row_ids = jax.lax.broadcasted_iota(jnp.int32, x.shape, 0)
            valid = (step * block_rows + row_ids) < total_rows
            _reduce_and_store(jnp.where(valid, x, 0.0),
                              jnp.where(valid, t, 0.0),
                              out_ref)

        @pl.when(jnp.logical_not(is_last))
        def _():
            _reduce_and_store(x, t, out_ref)
    else:
        _reduce_and_store(x, t, out_ref)


def _row_alignment(dtype):
    # Sublane packing: f32 -> 8-row tiles, bf16 -> 16, int8/fp8 -> 32.
    return max(_SUBLANES, 32 // jnp.dtype(dtype).itemsize)


def focal_tversky_loss(inputs, targets, smooth=1.0, alpha=0.25, beta=0.75,
                       gamma=2.0):
    """Pallas implementation of FocalTverskyLoss.forward. Returns an f32 scalar."""
    x_flat = inputs.reshape(-1)
    t_flat = targets.reshape(-1)
    n = x_flat.shape[0]

    rows = n // _LANES
    rem = n - rows * _LANES

    # <=127-element tail handled in plain JAX (no full-array jnp.pad copy).
    tail_xt = jnp.float32(0.0)
    tail_x = jnp.float32(0.0)
    tail_t = jnp.float32(0.0)
    if rem:
        xt_ = x_flat[rows * _LANES:].astype(jnp.float32)
        tt_ = t_flat[rows * _LANES:].astype(jnp.float32)
        tail_xt = jnp.sum(xt_ * tt_)
        tail_x = jnp.sum(xt_)
        tail_t = jnp.sum(tt_)

    if rows == 0:
        s_xt, s_x, s_t = tail_xt, tail_x, tail_t
    else:
        # Lane-dense 2-D view of the aligned prefix (free reshape when
        # n % 128 == 0, which is the common segmentation case).
        x2 = x_flat[:rows * _LANES].reshape(rows, _LANES)
        t2 = t_flat[:rows * _LANES].reshape(rows, _LANES)

        align = max(_row_alignment(x2.dtype), _row_alignment(t2.dtype))
        # Aim for >= 2 grid steps so the "parallel" axis can be sharded across
        # both v7x TensorCores, each step a multiple of the packing alignment
        # and capped at _MAX_BLOCK_ROWS.
        half = -(-rows // 2)
        block_rows = min(_MAX_BLOCK_ROWS, -(-half // align) * align)
        if block_rows >= rows:
            block_rows = rows  # single full-extent block (always legal)
        num_tiles = pl.cdiv(rows, block_rows)
        need_mask = (num_tiles * block_rows != rows)

        kernel = functools.partial(
            _focal_tversky_partials_kernel,
            block_rows=block_rows,
            total_rows=rows,
            need_mask=need_mask,
        )

        partials = pl.pallas_call(
            kernel,
            out_shape=jax.ShapeDtypeStruct((num_tiles, _SUBLANES, _LANES),
                                           jnp.float32),
            grid_spec=pltpu.PrefetchScalarGridSpec(
                num_scalar_prefetch=0,
                grid=(num_tiles,),
                in_specs=[
                    pl.BlockSpec((block_rows, _LANES), lambda i: (i, 0)),
                    pl.BlockSpec((block_rows, _LANES), lambda i: (i, 0)),
                ],
                out_specs=pl.BlockSpec((1, _SUBLANES, _LANES),
                                       lambda i: (i, 0, 0)),
            ),
            compiler_params=pltpu.CompilerParams(
                dimension_semantics=("parallel",)),
        )(x2, t2)

        # Tiny cross-tile + cross-lane combine in plain JAX.
        s_xt = jnp.sum(partials[:, 0, :]) + tail_xt
        s_x = jnp.sum(partials[:, 1, :]) + tail_x
        s_t = jnp.sum(partials[:, 2, :]) + tail_t

    tp = s_xt
    fp = s_x - s_xt
    fn = s_t - s_xt
    tversky = (tp + smooth) / (tp + alpha * fp + beta * fn + smooth)
    return (1.0 - tversky) ** gamma


def _reference(inputs, targets, smooth=1.0, alpha=0.25, beta=0.75, gamma=2.0):
    x = inputs.reshape(-1).astype(jnp.float32)
    t = targets.reshape(-1).astype(jnp.float32)
    tp = jnp.sum(x * t)
    fp = jnp.sum(x * (1.0 - t))
    fn = jnp.sum((1.0 - x) * t)
    tversky = (tp + smooth) / (tp + alpha * fp + beta * fn + smooth)
    return (1.0 - tversky) ** gamma


if __name__ == "__main__":
    key = jax.random.PRNGKey(0)
    k1, k2 = jax.random.split(key)

    # NCHW: batch=2, channels=4, spatial=16x16 (2048 elements, lane-aligned).
    inputs = jax.nn.sigmoid(
        jax.random.normal(k1, (2, 4, 16, 16), dtype=jnp.float32))
    targets = (jax.random.uniform(k2, (2, 4, 16, 16)) > 0.5).astype(jnp.float32)

    loss = jax.block_until_ready(focal_tversky_loss(inputs, targets))
    ref = jax.block_until_ready(_reference(inputs, targets))

    assert jnp.allclose(loss, ref, rtol=1e-5, atol=1e-6), (loss, ref)
    print("KERNEL_OK")
</pallas_src>

<mosaic_0001>
module attributes {stable_mosaic.version = 11 : i64} {
  func.func @_focal_tversky_partials_kernel(%arg0: i32, %arg1: memref<8x128xf32, #tpu.memory_space<vmem>>, %arg2: memref<8x128xf32, #tpu.memory_space<vmem>>, %arg3: memref<1x8x128xf32, #tpu.memory_space<vmem>>) attributes {dimension_semantics = [#tpu.dimension_semantics<parallel>], iteration_bounds = array<i64: 2>, scalar_prefetch = 0 : i64, scratch_operands = 0 : i64, tpu.core_type = #tpu.core_type<tc>, window_params = [{transform_indices = @transform_0, window_bounds = array<i64: 8, 128>}, {transform_indices = @transform_1, window_bounds = array<i64: 8, 128>}, {transform_indices = @transform_2, window_bounds = array<i64: 1, 8, 128>}]} {
    %c0 = arith.constant 0 : index
    %c0_0 = arith.constant 0 : index
    %0 = vector.load %arg1[%c0, %c0_0] : memref<8x128xf32, #tpu.memory_space<vmem>>, vector<8x128xf32>
    %c0_1 = arith.constant 0 : index
    %c0_2 = arith.constant 0 : index
    %1 = vector.load %arg2[%c0_1, %c0_2] : memref<8x128xf32, #tpu.memory_space<vmem>>, vector<8x128xf32>
    %2 = arith.mulf %0, %1 : vector<8x128xf32>
    %cst = arith.constant dense<0.000000e+00> : vector<128xf32>
    %3 = vector.multi_reduction <add>, %2, %cst [0] : vector<8x128xf32> to vector<128xf32>
    %4 = vector.shape_cast %3 : vector<128xf32> to vector<1x128xf32>
    %c0_3 = arith.constant 0 : index
    %c0_4 = arith.constant 0 : index
    %c0_5 = arith.constant 0 : index
    %5 = vector.load %arg3[%c0_3, %c0_4, %c0_5] : memref<1x8x128xf32, #tpu.memory_space<vmem>>, vector<1x1x128xf32>
    %6 = vector.shape_cast %5 : vector<1x1x128xf32> to vector<1x128xf32>
    %7 = vector.shape_cast %4 : vector<1x128xf32> to vector<1x1x128xf32>
    tpu.vector_store %arg3[%c0_3, %c0_4, %c0_5], %7 {strides = array<i32>} : memref<1x8x128xf32, #tpu.memory_space<vmem>>, vector<1x1x128xf32>,
    %cst_6 = arith.constant dense<0.000000e+00> : vector<128xf32>
    %8 = vector.multi_reduction <add>, %0, %cst_6 [0] : vector<8x128xf32> to vector<128xf32>
    %9 = vector.shape_cast %8 : vector<128xf32> to vector<1x128xf32>
    %c0_7 = arith.constant 0 : index
    %c1 = arith.constant 1 : index
    %c0_8 = arith.constant 0 : index
    %10 = vector.load %arg3[%c0_7, %c1, %c0_8] : memref<1x8x128xf32, #tpu.memory_space<vmem>>, vector<1x1x128xf32>
    %11 = vector.shape_cast %10 : vector<1x1x128xf32> to vector<1x128xf32>
    %12 = vector.shape_cast %9 : vector<1x128xf32> to vector<1x1x128xf32>
    tpu.vector_store %arg3[%c0_7, %c1, %c0_8], %12 {strides = array<i32>} : memref<1x8x128xf32, #tpu.memory_space<vmem>>, vector<1x1x128xf32>,
    %cst_9 = arith.constant dense<0.000000e+00> : vector<128xf32>
    %13 = vector.multi_reduction <add>, %1, %cst_9 [0] : vector<8x128xf32> to vector<128xf32>
    %14 = vector.shape_cast %13 : vector<128xf32> to vector<1x128xf32>
    %c0_10 = arith.constant 0 : index
    %c2 = arith.constant 2 : index
    %c0_11 = arith.constant 0 : index
    %15 = vector.load %arg3[%c0_10, %c2, %c0_11] : memref<1x8x128xf32, #tpu.memory_space<vmem>>, vector<1x1x128xf32>
    %16 = vector.shape_cast %15 : vector<1x1x128xf32> to vector<1x128xf32>
    %17 = vector.shape_cast %14 : vector<1x128xf32> to vector<1x1x128xf32>
    tpu.vector_store %arg3[%c0_10, %c2, %c0_11], %17 {strides = array<i32>} : memref<1x8x128xf32, #tpu.memory_space<vmem>>, vector<1x1x128xf32>,
    return
  }
  func.func @transform_0(%arg0: i32) -> (i32, i32) {
    %c0_i32 = arith.constant 0 : i32
    %c0_i32_0 = arith.constant 0 : i32
    return %arg0, %c0_i32 : i32, i32
  }
  func.func @transform_1(%arg0: i32) -> (i32, i32) {
    %c0_i32 = arith.constant 0 : i32
    %c0_i32_0 = arith.constant 0 : i32
    return %arg0, %c0_i32 : i32, i32
  }
  func.func @transform_2(%arg0: i32) -> (i32, i32, i32) {
    %c0_i32 = arith.constant 0 : i32
    %c0_i32_0 = arith.constant 0 : i32
    %c0_i32_1 = arith.constant 0 : i32
    return %arg0, %c0_i32, %c0_i32_0 : i32, i32, i32
  }
}

</mosaic_0001>

<bundles_post_ra>
// kernel: tpu_custom_call.1
= control target key start
LH: loop header
LB: loop body
LE: loop exit
PB: predicated region body
PF: predicated region fallthrough
CT: control target
= control target key end

     0   :  { %7 = vsyncpa [#allocation3], 0  ;;  %s752_s0 = inlined_call_operand.hbm [shape: f32[16,128], index: 0, kind: input, shape index: {}]   ;;  %s753_s1 = inlined_call_operand.hbm [shape: f32[16,128], index: 1, kind: input, shape index: {}]   ;;  %s754_s2 = inlined_call_operand.hbm [shape: f32[2,8,128], index: 2, kind: output, shape index: {}]  }
   0x1   :  { %9 = vsyncpa [#allocation3 + $0x1], 0 }
   0x2   :  { %10 = vsyncpa [#allocation6], 0 }
   0x3   :  { %12 = vsyncpa [#allocation6 + $0x1], 0 }
   0x4   :  { %13 = vsyncpa [#allocation4], 0 }
   0x5   :  { %15 = vsyncpa [#allocation4 + $0x1], 0  ;;  %s543_s9 = smov 0   ;;  %s545_s10 = smov 0  }
   0x6   :  { %s547_s11 = smov 0   ;;  %s549_s12 = smov 0  }
   0x7 LB: > { %s564_s13 = sadd.s32 4294967295, %s523_s12   ;;  %s327_s14 = sadd.s32 4294967294, %s523_s12   ;;  %s523_s12 = sphi %s549_s12, %s773_s12   ;;  %s519_s11 = sphi %s547_s11, %s772_s11   ;;  %s515_s10 = sphi %s545_s10, %s771_s10   ;;  %s511_s9 = sphi %s543_s9, %s770_s9  }
   0x8   : > { %s568_s15 = sadd.s32 1, %s523_s12   ;;  %s28_s16 = sadd.s32 1, %s519_s11 }
   0x9   : > { %s25_s17 = ssub.s32 %s523_s12, %s568_s15  ;;  %p35_p0 = scmp.ne.s32.totalorder %s519_s11, %s515_s10 }
   0xa   : > { %p26_p1 = scmp.eq.s32.totalorder %s25_s17, 0  ;;  %p36_p2 = scmp.eq.s32.totalorder %s523_s12, 0 }
   0xb   : > { %p41_p3 = scmp.ne.s32.totalorder %s515_s10, %s511_s9  ;;  %p42_p4 = scmp.eq.s32.totalorder %s564_s13, 0 }
   0xc   : > { %s580_s18 = scalar_select %p26_p1, %s519_s11, %s28_s16  }
   0xd   : > { %p582_p5 = por %p36_p2, %p35_p0  ;;  %p586_p6 = por %p42_p4, %p41_p3 }
   0xe   : > { %p91_p7 = scmp.eq.s32.totalorder %s564_s13, 1  ;;  %p97_p8 = scmp.eq.s32.totalorder %s327_s14, 1 }
   0xf   : > { %s758_s20 = scalar_select %p586_p6, 1, 0 }
  0x10   : > { %p359_p10 = scmp.lt.s32.totalorder %s523_s12, 2  ;;  %p593_p11 = por %p91_p7, %p35_p0 }
  0x11   : > { %p597_p12 = por %p97_p8, %p41_p3  ;;  %s602_s23 = sand.u32 1, %s519_s11  }
  0x12   : > { %s759_s21 = scalar_select %p593_p11, 1, 0 }
  0x13   : > { %s760_s22 = scalar_select %p597_p12, 1, 0 }
  0x14   : > { %s331_s24 = sshll.u32 %s523_s12, 7  ;;  %s330_s25 = sshll.u32 %s602_s23, 3 }
  0x15   : > { %s611_s28 = scalar_lea.hbm %s752_s0, %s331_s24  ;;  %s121_s29 = scalar_lea.vmem [#allocation2], %s330_s25 }
  0x16   : > { %s128_s30 = sshll.u32 %s121_s29, 4  ;;  %p617_p13 = pnand %p359_p10, %p582_p5  ;;  %s621_s30 = int_to_ptr.vmem [resolvable:$true] %s128_s30 }
  0x17   : > { %s118_s4 = scalar_lea.sflag [#allocation3], %s602_s23  ;;  %s393_s5 = scalar_lea.hbm %s611_s28, 128 }
  0x18   : > { %p394_p2 = scmp.ne.s32.totalorder %s611_s28, %s393_s5  ;;  %p395_p3 = pneg %p617_p13 }
  0x19   : > { %s398_s8 = scalar_lea.hbm %s752_s0, 256  ;;  %p399_p5 = scmp.lt.u32.totalorder %s611_s28, %s752_s0 }
  0x1a   : > { %p396_p4 = pnand %p395_p3, %p394_p2  ;;  %p400_p8 = scmp.lt.u32.totalorder %s398_s8, %s393_s5 }
  0x1b   : > { %p402_p9 = scmp.lt.u32.totalorder %s393_s5, %s611_s28 }
  0x1c   : > { %p397_p7 = pneg %p396_p4  ;;  %p401_p10 = por %p400_p8, %p399_p5 }
  0x1e   : > { %p403_p0 = por %p402_p9, %p401_p10 }
  0x20   : > { %p404_p1 = pnand %p403_p0, %p397_p7 }
  0x22   : > { %407 = shalt.err (!%p404_p1)
}
  0x23   : > { %s408_s17 = scalar_lea.vmem %s621_s30, 128  ;;  %s525_s19 = smov [#allocation2]  }
  0x24   : > { %p409_p2 = scmp.ne.s32.totalorder %s621_s30, %s408_s17  ;;  %s413_s26 = sshll.u32 %s525_s19, 4  ;;  %s414_s26 = int_to_ptr.vmem [resolvable:$false] %s413_s26 }
  0x25   : > { %s415_s27 = scalar_lea.vmem %s414_s26, 256  ;;  %p416_p11 = scmp.lt.s32.totalorder %s621_s30, %s414_s26 }
  0x26   : > { %p411_p4 = pnand %p409_p2, %p395_p3  ;;  %p417_p5 = scmp.lt.s32.totalorder %s415_s27, %s408_s17 }
  0x28   : > { %p412_p12 = pneg %p411_p4  ;;  %p418_p8 = por %p417_p5, %p416_p11 }
  0x2a   : > { %p419_p9 = pnand %p418_p8, %p412_p12 }
  0x2c   : > { %422 = shalt.err (!%p419_p9)
}
  0x2d   : > { %351 = dma.hbm_to_vmem [thread:$0]  (!%p617_p13), %s611_s28, 128, %s621_s30, %s118_s4  }
  0x2e   : > { %p762_p0 = scmp.lt.s32.totalorder %s523_s12, 3  ;;  %p763_p1 = scmp.ge.s32.totalorder %s523_s12, 1 }
  0x2f   : > { %s664_s7 = scalar_lea.hbm %s753_s1, %s331_s24  ;;  %s139_s8 = scalar_lea.vmem [#allocation5], %s330_s25 }
  0x30   : > { %p655_p7 = pnand %p763_p1, %p762_p0  ;;  %s146_s14 = sshll.u32 %s139_s8, 4  ;;  %s147_s14 = int_to_ptr.vmem [resolvable:$true] %s146_s14 }
  0x31   : > { %s136_s28 = scalar_lea.sflag [#allocation6], %s602_s23  ;;  %s423_s30 = scalar_lea.hbm %s664_s7, 128 }
  0x32   : > { %s764_s29 = scalar_select %p655_p7, 1, 0 }
  0x33   : > { %p424_p11 = scmp.ne.s32.totalorder %s664_s7, %s423_s30  ;;  %s428_s24 = scalar_lea.hbm %s753_s1, 256 }
  0x34   : > { %p429_p2 = scmp.lt.u32.totalorder %s664_s7, %s753_s1  ;;  %p430_p4 = scmp.lt.u32.totalorder %s428_s24, %s423_s30 }
  0x35   : > { %p426_p12 = pnand %p424_p11, %p395_p3  ;;  %p432_p8 = scmp.lt.u32.totalorder %s423_s30, %s664_s7 }
  0x36   : > { %p431_p5 = por %p430_p4, %p429_p2 }
  0x37   : > { %p427_p10 = pneg %p426_p12 }
  0x38   : > { %p433_p9 = por %p432_p8, %p431_p5 }
  0x3a   : > { %p434_p0 = pnand %p433_p9, %p427_p10 }
  0x3c   : > { %437 = shalt.err (!%p434_p0)
}
  0x3d   : > { %s438_s23 = scalar_lea.vmem %s147_s14, 128  ;;  %s526_s25 = smov [#allocation5]  }
  0x3e   : > { %p439_p1 = scmp.ne.s32.totalorder %s147_s14, %s438_s23  ;;  %s443_s26 = sshll.u32 %s526_s25, 4  ;;  %s444_s26 = int_to_ptr.vmem [resolvable:$false] %s443_s26 }
  0x3f   : > { %s445_s27 = scalar_lea.vmem %s444_s26, 256  ;;  %p446_p6 = scmp.lt.s32.totalorder %s147_s14, %s444_s26 }
  0x40   : > { %p441_p11 = pnand %p439_p1, %p395_p3  ;;  %p447_p7 = scmp.lt.s32.totalorder %s445_s27, %s438_s23 }
  0x42   : > { %p442_p12 = pneg %p441_p11  ;;  %p448_p2 = por %p447_p7, %p446_p6 }
  0x44   : > { %p449_p4 = pnand %p448_p2, %p442_p12 }
  0x46   : > { %452 = shalt.err (!%p449_p4)
}
  0x47   : > { %354 = dma.hbm_to_vmem [thread:$0]  (!%p617_p13), %s664_s7, 128, %s147_s14, %s136_s28  }
  0x48   : > { %p765_p10 = scmp.ne.s32.totalorder %s764_s29, 0 }
  0x49   : > { %s691_s5 = sand.u32 (!%p765_p10), 1, %s515_s10   ;;  %p766_p3 = scmp.ne.s32.totalorder (!%p765_p10), %s758_s20, 0 }
  0x4a   : > { %155 = sbr.rel (%p765_p10) target bundleno = 113 (0x71), region = 28  ;;  %s335_s6 = sshll.u32 (!%p765_p10), %s691_s5, 3 }
  0x4b   : > { %s158_s8 = scalar_lea.sflag (!%p765_p10), [#allocation3], %s691_s5  ;;  %s161_s30 = scalar_lea.vmem (!%p765_p10), [#allocation2], %s335_s6 }
  0x51   : > { %498 = dma.done.wait (%p766_p3), %s158_s8, 128  }
  0x52   : > { %500 = vsyncadd (%p766_p3), %s158_s8, 4294967168  ;;  %s167_s3 = scalar_lea.sflag [#allocation6], %s691_s5  ;;  %s170_s7 = scalar_lea.vmem [#allocation5], %s335_s6 }
  0x53   : > { %502 = dma.done.wait (%p766_p3), %s167_s3, 128  }
  0x54   : > { %504 = vsyncadd (%p766_p3), %s167_s3, 4294967168  ;;  %v196_v0 = vld [vmem:[%s161_s30] sm:$0xff]  ;;  %v197_v1 = vld [vmem:[%s170_s7] sm:$0xff]  ;;  %s195_s20 = scalar_lea.vmem [#allocation7], %s335_s6  ;;  %s339_s14 = sshll.u32 %s564_s13, 7 }
  0x55   : > { %v198_v2 = vmul.f32 %v197_v1, %v196_v0  ;;  %v206_v3 = vrot.slane %v196_v0, 4  ;;  %v213_v4 = vrot.slane %v197_v1, 4  ;;  %s234_s29 = sshll.u32 %s195_s20, 4  ;;  %s710_s16 = scalar_lea.hbm %s754_s2, %s339_s14  ;;  %s705_s29 = int_to_ptr.vmem [resolvable:$true] %s234_s29 }
  0x56   : > { %s221_s24 = scalar_lea.sflag [#allocation4], %s691_s5  ;;  %s453_s17 = scalar_lea.vmem %s705_s29, 128 }
  0x57   : > { %v199_v5 = vrot.slane %v198_v2, 4  ;;  %v207_v6 = vadd.f32 %v206_v3, %v196_v0  ;;  %v214_v7 = vadd.f32 %v213_v4, %v197_v1  ;;  %p454_p6 = scmp.ne.s32.totalorder %s705_s29, %s453_s17  ;;  %p767_p13 = scmp.ne.s32.totalorder %s759_s21, 0 }
  0x58   : > { %s527_s13 = smov [#allocation7]  }
  0x59   : > { %v200_v8 = vadd.f32 %v199_v5, %v198_v2  ;;  %v208_v9 = vrot.slane %v207_v6, 2  ;;  %v215_v10 = vrot.slane %v214_v7, 2  ;;  %p455_p7 = pnand %p454_p6, %p767_p13  ;;  %s457_s19 = sshll.u32 %s527_s13, 4  ;;  %s458_s19 = int_to_ptr.vmem [resolvable:$false] %s457_s19 }
  0x5a   : > { %s459_s23 = scalar_lea.vmem %s458_s19, 256  ;;  %p460_p8 = scmp.lt.s32.totalorder %s705_s29, %s458_s19 }
  0x5b   : > { %v201_v11 = vrot.slane %v200_v8, 2  ;;  %v209_v12 = vadd.f32 %v208_v9, %v207_v6  ;;  %v216_v13 = vadd.f32 %v215_v10, %v214_v7  ;;  %p456_p5 = pneg %p455_p7  ;;  %p461_p9 = scmp.lt.s32.totalorder %s459_s23, %s453_s17 }
  0x5d   : > { %v202_v14 = vadd.f32 %v201_v11, %v200_v8  ;;  %v210_v15 = vrot.slane %v209_v12, 1  ;;  %v217_v16 = vrot.slane %v216_v13, 1  ;;  %p462_p0 = por %p461_p9, %p460_p8 }
  0x5f   : > { %v203_v17 = vrot.slane %v202_v14, 1  ;;  %v211_v18 = vadd.f32 %v210_v15, %v209_v12  ;;  %v218_v19 = vadd.f32 %v217_v16, %v216_v13  ;;  %p463_p1 = pnand %p462_p0, %p456_p5 }
  0x61   : > { %v204_v20 = vadd.f32 %v203_v17, %v202_v14  ;;  %212 = vst [vmem:[%s195_s20 + $0x1] sm:$0x1] %v211_v18  ;;  %219 = vst [vmem:[%s195_s20 + $0x2] sm:$0x1] %v218_v19 }
  0x63   : > { %205 = vst [vmem:[%s195_s20] sm:$0x1] %v204_v20 }
  0x64   : > { %466 = shalt.err (!%p463_p1)
}
  0x65   : > { %s467_s25 = scalar_lea.hbm %s710_s16, 128  ;;  %s471_s5 = scalar_lea.hbm %s754_s2, 256 }
  0x66   : > { %p468_p11 = scmp.ne.s32.totalorder %s710_s16, %s467_s25  ;;  %p472_p4 = scmp.lt.u32.totalorder %s710_s16, %s754_s2 }
  0x67   : > { %p473_p10 = scmp.lt.u32.totalorder %s471_s5, %s467_s25  ;;  %p475_p6 = scmp.lt.u32.totalorder %s467_s25, %s710_s16 }
  0x68   : > { %p469_p12 = pnand %p468_p11, %p767_p13 }
  0x69   : > { %p474_p3 = por %p473_p10, %p472_p4 }
  0x6a   : > { %p470_p2 = pneg %p469_p12 }
  0x6b   : > { %p476_p7 = por %p475_p6, %p474_p3 }
  0x6d   : > { %p477_p5 = pnand %p476_p7, %p470_p2 }
  0x6f   : > { %480 = shalt.err (!%p477_p5)
}
  0x70   : > { %346 = dma.vmem_to_hbm [thread:$0]  (%p767_p13), %s705_s29, 128, %s710_s16, %s221_s24  }
  0x71 PF: > { %s246_s30 = sand.u32 1, %s511_s9   ;;  %p768_p8 = scmp.ne.s32.totalorder %s760_s22, 0 }
  0x72   : > { %p769_p9 = scmp.ge.s32.totalorder %s523_s12, 2  ;;  %s247_s3 = scalar_lea.sflag [#allocation4], %s246_s30 }
  0x74   : > { %p356_p0 = pnand %p769_p9, %p768_p8 }
  0x76   : > { %506 = dma.done.wait (!%p356_p0), %s247_s3, 128  }
  0x77   : > { %508 = vsyncadd (!%p356_p0), %s247_s3, 4294967168  ;;  %p18_p1 = scmp.ge.s32.totalorder %s568_s15, 4   ;;  %s770_s9 = smov %s515_s10 }
  0x78   : > { %s771_s10 = smov %s519_s11  ;;  %s772_s11 = smov %s580_s18 }
  0x79   : > { %s773_s12 = smov %s568_s15  ;;  %20 = sbr.rel (!%p18_p1) target bundleno = 7 (0x7), region = 86 }
  0x80   :  { %252 = vsyncpa [#allocation3], 1 }
  0x81   :  { %254 = vsyncpa [#allocation3 + $0x1], 1 }
  0x82   :  { %255 = vsyncpa [#allocation6], 1 }
  0x83   :  { %257 = vsyncpa [#allocation6 + $0x1], 1 }
  0x84   :  { %258 = vsyncpa [#allocation4], 1 }
  0x85   :  { %260 = vsyncpa [#allocation4 + $0x1], 1 }

</bundles_post_ra>
